<compile_context>
chip_gen: v6e
topology: v6e:2x2x1
jax: 0.10.0
libtpu: 0.0.40
codegen_flags: <defaults>
</compile_context>

<pallas_src>
import functools

import numpy as np

import jax
import jax.numpy as jnp
from jax import lax
from jax.experimental import pallas as pl
from jax.experimental.pallas import tpu as pltpu


# ----------------------------- in-kernel helpers -----------------------------

def _conv3x3_same_stage(buf_ref, w_ref, b_ref, relu, H, W, base,
                        keep_l, keep_r):
    """One 3x3 'SAME' conv stage in lane-dense (C, H*W) layout.

    buf_ref: VMEM ref (Cin, L): zero halo + row-major image at lane offset
             `base` (base is a multiple of 128 and >= W+1), so every tap is a
             static lane shift of the buffer.
    w_ref  : (3, 3, Cout, Cin) weights, b_ref: (Cout, 1) bias.
    keep_l/keep_r: (1, H*W) 0/1 float masks killing the horizontally wrapped
             pixel for the kw==0 / kw==2 taps.
    Returns the (Cout, H*W) f32 result (bias folded into init, optional relu).
    """
    HW = H * W
    cout = w_ref.shape[2]
    bv = buf_ref[...]                                   # single VMEM read
    acc = jnp.broadcast_to(b_ref[...], (cout, HW))      # bias folded into init
    for kh in range(3):
        for kw in range(3):
            s = base + (kh - 1) * W + (kw - 1)          # static lane shift
            patch = bv[:, s:s + HW]                     # (Cin, HW)
            if kw == 0:
                patch = patch * keep_l                  # kill wrapped j==0
            elif kw == 2:
                patch = patch * keep_r                  # kill wrapped j==W-1
            acc = acc + jnp.dot(w_ref[kh, kw], patch,
                                preferred_element_type=jnp.float32)
    if relu:
        acc = jnp.maximum(acc, 0.0)
    return acc


def _fused_two_conv_kernel(x_ref, m_ref, w1_ref, b1_ref, w2_ref, b2_ref,
                           o_ref, buf1, buf2, *, relu1, relu2, H, W, base):
    """conv3x3(SAME)+[relu] -> conv3x3(SAME)+[relu], fused, one batch element.

    x_ref : (1, Cin, H*W)      NCHW input, spatially flattened (lane-dense)
    m_ref : (2, H*W)           [keep_left; keep_right] 0/1 masks
    o_ref : (1, Cout, H*W)     lane-dense output (reshaped to NCHW outside)
    buf1/buf2: VMEM scratch (C, L) holding the zero-haloed stage inputs.
    """
    HW = H * W
    keep_l = m_ref[0:1, :]
    keep_r = m_ref[1:2, :]

    # stage-1 input: zero halo + image at aligned lane offset `base`
    buf1[...] = jnp.zeros_like(buf1)
    buf1[:, pl.ds(base, HW)] = x_ref[0]
    y1 = _conv3x3_same_stage(buf1, w1_ref, b1_ref, relu1, H, W, base,
                             keep_l, keep_r)

    # stage-2 input: conv1 result never leaves the core
    buf2[...] = jnp.zeros_like(buf2)
    buf2[:, pl.ds(base, HW)] = y1
    o_ref[0] = _conv3x3_same_stage(buf2, w2_ref, b2_ref, relu2, H, W, base,
                                   keep_l, keep_r)


def _single_conv_kernel(x_ref, m_ref, w_ref, b_ref, o_ref, buf, *,
                        relu, H, W, base):
    """Fallback single conv3x3(SAME)+[relu] stage (odd number of conv stages)."""
    HW = H * W
    keep_l = m_ref[0:1, :]
    keep_r = m_ref[1:2, :]
    buf[...] = jnp.zeros_like(buf)
    buf[:, pl.ds(base, HW)] = x_ref[0]
    o_ref[0] = _conv3x3_same_stage(buf, w_ref, b_ref, relu, H, W, base,
                                   keep_l, keep_r)


# ----------------------------- Pallas wrappers -------------------------------

def _edge_masks(H, W):
    """(2, H*W) float masks: row 0 keeps all lanes except column 0, row 1 keeps
    all lanes except column W-1 (trace-time constants)."""
    col = np.arange(H * W, dtype=np.int64) % W
    return jnp.asarray(np.stack([(col != 0), (col != W - 1)]).astype(np.float32))


def _halo_layout(H, W):
    """Image start offset (multiple of 128, >= W+1) and total buffer length."""
    base = ((W + 1 + 127) // 128) * 128
    return base, base + H * W + W + 1


def conv3x3_x2_fused(x_ncs, w1, b1, relu1, w2, b2, relu2, H, W):
    """Two fused conv3x3(SAME)+[relu] stages in one pallas_call (the hot path).

    x_ncs: (N, Cin, H*W) f32 (NCHW, spatially flattened -> metadata-only).
    w1/w2: OIHW (Cout, Cin, 3, 3) PyTorch-layout weights; b1/b2: (Cout,).
    Returns (N, Cout, H*W).
    """
    N, Cin, HW = x_ncs.shape
    Cmid = w1.shape[0]
    Cout = w2.shape[0]
    base, L = _halo_layout(H, W)
    w1_t = jnp.transpose(w1, (2, 3, 0, 1))          # (3,3,Cmid,Cin), trace-time
    w2_t = jnp.transpose(w2, (2, 3, 0, 1))          # (3,3,Cout,Cmid)
    masks = _edge_masks(H, W)
    return pl.pallas_call(
        functools.partial(_fused_two_conv_kernel, relu1=relu1, relu2=relu2,
                          H=H, W=W, base=base),
        out_shape=jax.ShapeDtypeStruct((N, Cout, HW), jnp.float32),
        grid=(N,),
        in_specs=[
            pl.BlockSpec((1, Cin, HW), lambda n: (n, 0, 0)),
            pl.BlockSpec((2, HW), lambda n: (0, 0)),
            pl.BlockSpec((3, 3, Cmid, Cin), lambda n: (0, 0, 0, 0)),
            pl.BlockSpec((Cmid, 1), lambda n: (0, 0)),
            pl.BlockSpec((3, 3, Cout, Cmid), lambda n: (0, 0, 0, 0)),
            pl.BlockSpec((Cout, 1), lambda n: (0, 0)),
        ],
        out_specs=pl.BlockSpec((1, Cout, HW), lambda n: (n, 0, 0)),
        scratch_shapes=[pltpu.VMEM((Cin, L), jnp.float32),
                        pltpu.VMEM((Cmid, L), jnp.float32)],
        compiler_params=pltpu.CompilerParams(
            dimension_semantics=("parallel",)),   # v7x: 2 batch elems -> 2 TCs
    )(x_ncs, masks, w1_t, b1.reshape(-1, 1), w2_t, b2.reshape(-1, 1))


def conv3x3_single(x_ncs, w, b, relu, H, W):
    """Single conv3x3(SAME)+[relu] stage (fallback for other truncations)."""
    N, Cin, HW = x_ncs.shape
    Cout = w.shape[0]
    base, L = _halo_layout(H, W)
    w_t = jnp.transpose(w, (2, 3, 0, 1))
    masks = _edge_masks(H, W)
    return pl.pallas_call(
        functools.partial(_single_conv_kernel, relu=relu, H=H, W=W, base=base),
        out_shape=jax.ShapeDtypeStruct((N, Cout, HW), jnp.float32),
        grid=(N,),
        in_specs=[
            pl.BlockSpec((1, Cin, HW), lambda n: (n, 0, 0)),
            pl.BlockSpec((2, HW), lambda n: (0, 0)),
            pl.BlockSpec((3, 3, Cout, Cin), lambda n: (0, 0, 0, 0)),
            pl.BlockSpec((Cout, 1), lambda n: (0, 0)),
        ],
        out_specs=pl.BlockSpec((1, Cout, HW), lambda n: (n, 0, 0)),
        scratch_shapes=[pltpu.VMEM((Cin, L), jnp.float32)],
        compiler_params=pltpu.CompilerParams(
            dimension_semantics=("parallel",)),
    )(x_ncs, masks, w_t, b.reshape(-1, 1))


# ------------------------ new_model pruning semantics ------------------------

class NewModel:
    """Mirrors the PyTorch `new_model` truncation logic over an ordered
    name -> (kind, params) layer dict, executing the kept prefix with fused
    Pallas kernels (conv+relu pairs are fused; two pairs share one kernel)."""

    def __init__(self, model_layers, output_layer=None):
        self.layers = list(model_layers.keys())
        self.layer_count = 0
        for l in self.layers:
            if l != output_layer:
                self.layer_count += 1
            else:
                break
        kept = dict(model_layers)
        # pop trailing layers exactly as the PyTorch module does
        for i in range(1, len(self.layers) - self.layer_count):
            kept.pop(self.layers[-i])
        self.net = kept  # insertion order preserved => nn.Sequential prefix

    def __call__(self, x_nchw):
        N, C, H, W = x_nchw.shape
        # group kept layers into conv stages with an optional trailing relu
        names = list(self.net.keys())
        stages = []
        i = 0
        while i < len(names):
            kind, params = self.net[names[i]]
            if kind == "conv":
                fuse_relu = (i + 1 < len(names)
                             and self.net[names[i + 1]][0] == "relu")
                stages.append((params["w"], params["b"], fuse_relu))
                i += 2 if fuse_relu else 1
            else:
                # TODO(synk): pool/flatten/fc are pruned away for
                # output_layer="relu2"; not needed on the executed path.
                raise NotImplementedError(kind)

        y = x_nchw.reshape(N, C, H * W)        # metadata-only reshape
        j = 0
        while j < len(stages):
            if j + 1 < len(stages):
                (w1, b1, r1), (w2, b2, r2) = stages[j], stages[j + 1]
                y = conv3x3_x2_fused(y, w1, b1, r1, w2, b2, r2, H, W)
                j += 2
            else:
                w, b, r = stages[j]
                y = conv3x3_single(y, w, b, r, H, W)
                j += 1
        return y.reshape(N, y.shape[1], H, W)  # back to NCHW, metadata-only


# ----------------------------------- main -------------------------------------

if __name__ == "__main__":
    key = jax.random.PRNGKey(0)
    k1, k2, k3, k4, k5, k6, kx = jax.random.split(key, 7)

    Cin, Cmid, H, W, N = 4, 8, 16, 16, 2

    # deterministic synthetic "pretrained" parameters (OIHW conv weights)
    w1 = jax.random.normal(k1, (Cmid, Cin, 3, 3), jnp.float32) * 0.1
    b1 = jax.random.normal(k2, (Cmid,), jnp.float32) * 0.1
    w2 = jax.random.normal(k3, (Cmid, Cmid, 3, 3), jnp.float32) * 0.1
    b2 = jax.random.normal(k4, (Cmid,), jnp.float32) * 0.1
    # fc params exist only so the pruning has something to drop
    wfc = jax.random.normal(k5, (10, Cmid * (H // 2) * (W // 2)), jnp.float32) * 0.01
    bfc = jax.random.normal(k6, (10,), jnp.float32) * 0.01

    pretrained = {
        "conv1": ("conv", {"w": w1, "b": b1}),
        "relu1": ("relu", None),
        "conv2": ("conv", {"w": w2, "b": b2}),
        "relu2": ("relu", None),
        "pool": ("maxpool2", None),
        "flatten": ("flatten", None),
        "fc": ("linear", {"w": wfc, "b": bfc}),
    }

    model = NewModel(pretrained, output_layer="relu2")

    # PyTorch-style NCHW input (kernel consumes it directly)
    x = jax.random.normal(kx, (N, Cin, H, W), jnp.float32)

    fwd = jax.jit(model.__call__)
    out = jax.block_until_ready(fwd(x))

    # pure-JAX reference for the pruned prefix (NCHW / OIHW, like PyTorch)
    dn = ("NCHW", "OIHW", "NCHW")
    ref = lax.conv_general_dilated(x, w1, (1, 1), "SAME",
                                   dimension_numbers=dn) + b1.reshape(1, -1, 1, 1)
    ref = jnp.maximum(ref, 0.0)
    ref = lax.conv_general_dilated(ref, w2, (1, 1), "SAME",
                                   dimension_numbers=dn) + b2.reshape(1, -1, 1, 1)
    ref = jnp.maximum(ref, 0.0)

    assert out.shape == (N, Cmid, H, W), out.shape
    assert jnp.allclose(out, ref, rtol=1e-5, atol=1e-5), "mismatch vs reference"
    print("KERNEL_OK")
</pallas_src>

<mosaic_0001>
module attributes {stable_mosaic.version = 11 : i64} {
  func.func @_fused_two_conv_kernel(%arg0: i32, %arg1: memref<1x4x256xf32, #tpu.memory_space<vmem>>, %arg2: memref<2x256xf32, #tpu.memory_space<vmem>>, %arg3: memref<3x3x8x4xf32, #tpu.memory_space<vmem>>, %arg4: memref<8x1xf32, #tpu.memory_space<vmem>>, %arg5: memref<3x3x8x8xf32, #tpu.memory_space<vmem>>, %arg6: memref<8x1xf32, #tpu.memory_space<vmem>>, %arg7: memref<1x8x256xf32, #tpu.memory_space<vmem>>, %arg8: memref<4x401xf32, #tpu.memory_space<vmem>>, %arg9: memref<8x401xf32, #tpu.memory_space<vmem>>) attributes {dimension_semantics = [#tpu.dimension_semantics<parallel>], iteration_bounds = array<i64: 2>, scalar_prefetch = 0 : i64, scratch_operands = 2 : i64, tpu.core_type = #tpu.core_type<tc>, window_params = [{transform_indices = @transform_0, window_bounds = array<i64: 1, 4, 256>}, {pipeline_mode = #tpu.pipeline_mode<synchronous>, transform_indices = @transform_1, window_bounds = array<i64: 2, 256>}, {pipeline_mode = #tpu.pipeline_mode<synchronous>, transform_indices = @transform_2, window_bounds = array<i64: 3, 3, 8, 4>}, {pipeline_mode = #tpu.pipeline_mode<synchronous>, transform_indices = @transform_3, window_bounds = array<i64: 8, 1>}, {pipeline_mode = #tpu.pipeline_mode<synchronous>, transform_indices = @transform_4, window_bounds = array<i64: 3, 3, 8, 8>}, {pipeline_mode = #tpu.pipeline_mode<synchronous>, transform_indices = @transform_5, window_bounds = array<i64: 8, 1>}, {transform_indices = @transform_6, window_bounds = array<i64: 1, 8, 256>}]} {
    %c0 = arith.constant 0 : index
    %c0_0 = arith.constant 0 : index
    %0 = vector.load %arg2[%c0, %c0_0] : memref<2x256xf32, #tpu.memory_space<vmem>>, vector<1x256xf32>
    %c1 = arith.constant 1 : index
    %c0_1 = arith.constant 0 : index
    %1 = vector.load %arg2[%c1, %c0_1] : memref<2x256xf32, #tpu.memory_space<vmem>>, vector<1x256xf32>
    %cst = arith.constant 0.000000e+00 : f32
    %2 = vector.broadcast %cst : f32 to vector<4x401xf32>
    %c0_2 = arith.constant 0 : index
    %c0_3 = arith.constant 0 : index
    %3 = vector.load %arg8[%c0_2, %c0_3] : memref<4x401xf32, #tpu.memory_space<vmem>>, vector<4x401xf32>
    tpu.vector_store %arg8[%c0_2, %c0_3], %2 {strides = array<i32>} : memref<4x401xf32, #tpu.memory_space<vmem>>, vector<4x401xf32>,
    %c0_4 = arith.constant 0 : index
    %c0_5 = arith.constant 0 : index
    %c0_6 = arith.constant 0 : index
    %4 = vector.load %arg1[%c0_4, %c0_5, %c0_6] : memref<1x4x256xf32, #tpu.memory_space<vmem>>, vector<1x4x256xf32>
    %5 = vector.shape_cast %4 : vector<1x4x256xf32> to vector<4x256xf32>
    %c0_7 = arith.constant 0 : index
    %c128 = arith.constant 128 : index
    %6 = vector.load %arg8[%c0_7, %c128] : memref<4x401xf32, #tpu.memory_space<vmem>>, vector<4x256xf32>
    tpu.vector_store %arg8[%c0_7, %c128], %5 {strides = array<i32>} : memref<4x401xf32, #tpu.memory_space<vmem>>, vector<4x256xf32>,
    %c0_8 = arith.constant 0 : index
    %c0_9 = arith.constant 0 : index
    %7 = vector.load %arg8[%c0_8, %c0_9] : memref<4x401xf32, #tpu.memory_space<vmem>>, vector<4x401xf32>
    %c0_10 = arith.constant 0 : index
    %c0_11 = arith.constant 0 : index
    %8 = vector.load %arg4[%c0_10, %c0_11] : memref<8x1xf32, #tpu.memory_space<vmem>>, vector<8x1xf32>
    %9 = vector.shape_cast %8 : vector<8x1xf32> to vector<8x1xf32>
    %10 = vector.broadcast %9 : vector<8x1xf32> to vector<8x256xf32>
    %11 = vector.extract_strided_slice %7 {offsets = [0, 111], sizes = [4, 256], strides = [1, 1]} : vector<4x401xf32> to vector<4x256xf32>
    %12 = vector.broadcast %0 : vector<1x256xf32> to vector<4x256xf32>
    %13 = arith.mulf %11, %12 : vector<4x256xf32>
    %c0_12 = arith.constant 0 : index
    %c0_13 = arith.constant 0 : index
    %c0_14 = arith.constant 0 : index
    %c0_15 = arith.constant 0 : index
    %14 = vector.load %arg3[%c0_12, %c0_13, %c0_14, %c0_15] : memref<3x3x8x4xf32, #tpu.memory_space<vmem>>, vector<1x1x8x4xf32>
    %15 = vector.shape_cast %14 : vector<1x1x8x4xf32> to vector<8x4xf32>
    %cst_16 = arith.constant dense<0.000000e+00> : vector<8x256xf32>
    %16 = tpu.matmul %15, %13, %cst_16 {dimension_numbers = #tpu.dot_dimension_numbers<[1], [0], [0], [1], [0, 0, 1, 1], [], []>} : vector<8x4xf32>, vector<4x256xf32>, vector<8x256xf32> -> vector<8x256xf32>
    %17 = arith.addf %10, %16 : vector<8x256xf32>
    %18 = vector.extract_strided_slice %7 {offsets = [0, 112], sizes = [4, 256], strides = [1, 1]} : vector<4x401xf32> to vector<4x256xf32>
    %c0_17 = arith.constant 0 : index
    %c1_18 = arith.constant 1 : index
    %c0_19 = arith.constant 0 : index
    %c0_20 = arith.constant 0 : index
    %19 = vector.load %arg3[%c0_17, %c1_18, %c0_19, %c0_20] : memref<3x3x8x4xf32, #tpu.memory_space<vmem>>, vector<1x1x8x4xf32>
    %20 = vector.shape_cast %19 : vector<1x1x8x4xf32> to vector<8x4xf32>
    %cst_21 = arith.constant dense<0.000000e+00> : vector<8x256xf32>
    %21 = tpu.matmul %20, %18, %cst_21 {dimension_numbers = #tpu.dot_dimension_numbers<[1], [0], [0], [1], [0, 0, 1, 1], [], []>} : vector<8x4xf32>, vector<4x256xf32>, vector<8x256xf32> -> vector<8x256xf32>
    %22 = arith.addf %17, %21 : vector<8x256xf32>
    %23 = vector.extract_strided_slice %7 {offsets = [0, 113], sizes = [4, 256], strides = [1, 1]} : vector<4x401xf32> to vector<4x256xf32>
    %24 = vector.broadcast %1 : vector<1x256xf32> to vector<4x256xf32>
    %25 = arith.mulf %23, %24 : vector<4x256xf32>
    %c0_22 = arith.constant 0 : index
    %c2 = arith.constant 2 : index
    %c0_23 = arith.constant 0 : index
    %c0_24 = arith.constant 0 : index
    %26 = vector.load %arg3[%c0_22, %c2, %c0_23, %c0_24] : memref<3x3x8x4xf32, #tpu.memory_space<vmem>>, vector<1x1x8x4xf32>
    %27 = vector.shape_cast %26 : vector<1x1x8x4xf32> to vector<8x4xf32>
    %cst_25 = arith.constant dense<0.000000e+00> : vector<8x256xf32>
    %28 = tpu.matmul %27, %25, %cst_25 {dimension_numbers = #tpu.dot_dimension_numbers<[1], [0], [0], [1], [0, 0, 1, 1], [], []>} : vector<8x4xf32>, vector<4x256xf32>, vector<8x256xf32> -> vector<8x256xf32>
    %29 = arith.addf %22, %28 : vector<8x256xf32>
    %30 = vector.extract_strided_slice %7 {offsets = [0, 127], sizes = [4, 256], strides = [1, 1]} : vector<4x401xf32> to vector<4x256xf32>
    %31 = vector.broadcast %0 : vector<1x256xf32> to vector<4x256xf32>
    %32 = arith.mulf %30, %31 : vector<4x256xf32>
    %c1_26 = arith.constant 1 : index
    %c0_27 = arith.constant 0 : index
    %c0_28 = arith.constant 0 : index
    %c0_29 = arith.constant 0 : index
    %33 = vector.load %arg3[%c1_26, %c0_27, %c0_28, %c0_29] : memref<3x3x8x4xf32, #tpu.memory_space<vmem>>, vector<1x1x8x4xf32>
    %34 = vector.shape_cast %33 : vector<1x1x8x4xf32> to vector<8x4xf32>
    %cst_30 = arith.constant dense<0.000000e+00> : vector<8x256xf32>
    %35 = tpu.matmul %34, %32, %cst_30 {dimension_numbers = #tpu.dot_dimension_numbers<[1], [0], [0], [1], [0, 0, 1, 1], [], []>} : vector<8x4xf32>, vector<4x256xf32>, vector<8x256xf32> -> vector<8x256xf32>
    %36 = arith.addf %29, %35 : vector<8x256xf32>
    %37 = vector.extract_strided_slice %7 {offsets = [0, 128], sizes = [4, 256], strides = [1, 1]} : vector<4x401xf32> to vector<4x256xf32>
    %c1_31 = arith.constant 1 : index
    %c1_32 = arith.constant 1 : index
    %c0_33 = arith.constant 0 : index
    %c0_34 = arith.constant 0 : index
    %38 = vector.load %arg3[%c1_31, %c1_32, %c0_33, %c0_34] : memref<3x3x8x4xf32, #tpu.memory_space<vmem>>, vector<1x1x8x4xf32>
    %39 = vector.shape_cast %38 : vector<1x1x8x4xf32> to vector<8x4xf32>
    %cst_35 = arith.constant dense<0.000000e+00> : vector<8x256xf32>
    %40 = tpu.matmul %39, %37, %cst_35 {dimension_numbers = #tpu.dot_dimension_numbers<[1], [0], [0], [1], [0, 0, 1, 1], [], []>} : vector<8x4xf32>, vector<4x256xf32>, vector<8x256xf32> -> vector<8x256xf32>
    %41 = arith.addf %36, %40 : vector<8x256xf32>
    %42 = vector.extract_strided_slice %7 {offsets = [0, 129], sizes = [4, 256], strides = [1, 1]} : vector<4x401xf32> to vector<4x256xf32>
    %43 = vector.broadcast %1 : vector<1x256xf32> to vector<4x256xf32>
    %44 = arith.mulf %42, %43 : vector<4x256xf32>
    %c1_36 = arith.constant 1 : index
    %c2_37 = arith.constant 2 : index
    %c0_38 = arith.constant 0 : index
    %c0_39 = arith.constant 0 : index
    %45 = vector.load %arg3[%c1_36, %c2_37, %c0_38, %c0_39] : memref<3x3x8x4xf32, #tpu.memory_space<vmem>>, vector<1x1x8x4xf32>
    %46 = vector.shape_cast %45 : vector<1x1x8x4xf32> to vector<8x4xf32>
    %cst_40 = arith.constant dense<0.000000e+00> : vector<8x256xf32>
    %47 = tpu.matmul %46, %44, %cst_40 {dimension_numbers = #tpu.dot_dimension_numbers<[1], [0], [0], [1], [0, 0, 1, 1], [], []>} : vector<8x4xf32>, vector<4x256xf32>, vector<8x256xf32> -> vector<8x256xf32>
    %48 = arith.addf %41, %47 : vector<8x256xf32>
    %49 = vector.extract_strided_slice %7 {offsets = [0, 143], sizes = [4, 256], strides = [1, 1]} : vector<4x401xf32> to vector<4x256xf32>
    %50 = vector.broadcast %0 : vector<1x256xf32> to vector<4x256xf32>
    %51 = arith.mulf %49, %50 : vector<4x256xf32>
    %c2_41 = arith.constant 2 : index
    %c0_42 = arith.constant 0 : index
    %c0_43 = arith.constant 0 : index
    %c0_44 = arith.constant 0 : index
    %52 = vector.load %arg3[%c2_41, %c0_42, %c0_43, %c0_44] : memref<3x3x8x4xf32, #tpu.memory_space<vmem>>, vector<1x1x8x4xf32>
    %53 = vector.shape_cast %52 : vector<1x1x8x4xf32> to vector<8x4xf32>
    %cst_45 = arith.constant dense<0.000000e+00> : vector<8x256xf32>
    %54 = tpu.matmul %53, %51, %cst_45 {dimension_numbers = #tpu.dot_dimension_numbers<[1], [0], [0], [1], [0, 0, 1, 1], [], []>} : vector<8x4xf32>, vector<4x256xf32>, vector<8x256xf32> -> vector<8x256xf32>
    %55 = arith.addf %48, %54 : vector<8x256xf32>
    %56 = vector.extract_strided_slice %7 {offsets = [0, 144], sizes = [4, 256], strides = [1, 1]} : vector<4x401xf32> to vector<4x256xf32>
    %c2_46 = arith.constant 2 : index
    %c1_47 = arith.constant 1 : index
    %c0_48 = arith.constant 0 : index
    %c0_49 = arith.constant 0 : index
    %57 = vector.load %arg3[%c2_46, %c1_47, %c0_48, %c0_49] : memref<3x3x8x4xf32, #tpu.memory_space<vmem>>, vector<1x1x8x4xf32>
    %58 = vector.shape_cast %57 : vector<1x1x8x4xf32> to vector<8x4xf32>
    %cst_50 = arith.constant dense<0.000000e+00> : vector<8x256xf32>
    %59 = tpu.matmul %58, %56, %cst_50 {dimension_numbers = #tpu.dot_dimension_numbers<[1], [0], [0], [1], [0, 0, 1, 1], [], []>} : vector<8x4xf32>, vector<4x256xf32>, vector<8x256xf32> -> vector<8x256xf32>
    %60 = arith.addf %55, %59 : vector<8x256xf32>
    %61 = vector.extract_strided_slice %7 {offsets = [0, 145], sizes = [4, 256], strides = [1, 1]} : vector<4x401xf32> to vector<4x256xf32>
    %62 = vector.broadcast %1 : vector<1x256xf32> to vector<4x256xf32>
    %63 = arith.mulf %61, %62 : vector<4x256xf32>
    %c2_51 = arith.constant 2 : index
    %c2_52 = arith.constant 2 : index
    %c0_53 = arith.constant 0 : index
    %c0_54 = arith.constant 0 : index
    %64 = vector.load %arg3[%c2_51, %c2_52, %c0_53, %c0_54] : memref<3x3x8x4xf32, #tpu.memory_space<vmem>>, vector<1x1x8x4xf32>
    %65 = vector.shape_cast %64 : vector<1x1x8x4xf32> to vector<8x4xf32>
    %cst_55 = arith.constant dense<0.000000e+00> : vector<8x256xf32>
    %66 = tpu.matmul %65, %63, %cst_55 {dimension_numbers = #tpu.dot_dimension_numbers<[1], [0], [0], [1], [0, 0, 1, 1], [], []>} : vector<8x4xf32>, vector<4x256xf32>, vector<8x256xf32> -> vector<8x256xf32>
    %67 = arith.addf %60, %66 : vector<8x256xf32>
    %cst_56 = arith.constant 0.000000e+00 : f32
    %68 = vector.broadcast %cst_56 : f32 to vector<8x256xf32>
    %69 = arith.maximumf %67, %68 : vector<8x256xf32>
    %cst_57 = arith.constant 0.000000e+00 : f32
    %70 = vector.broadcast %cst_57 : f32 to vector<8x401xf32>
    %c0_58 = arith.constant 0 : index
    %c0_59 = arith.constant 0 : index
    %71 = vector.load %arg9[%c0_58, %c0_59] : memref<8x401xf32, #tpu.memory_space<vmem>>, vector<8x401xf32>
    tpu.vector_store %arg9[%c0_58, %c0_59], %70 {strides = array<i32>} : memref<8x401xf32, #tpu.memory_space<vmem>>, vector<8x401xf32>,
    %c0_60 = arith.constant 0 : index
    %c128_61 = arith.constant 128 : index
    %72 = vector.load %arg9[%c0_60, %c128_61] : memref<8x401xf32, #tpu.memory_space<vmem>>, vector<8x256xf32>
    tpu.vector_store %arg9[%c0_60, %c128_61], %69 {strides = array<i32>} : memref<8x401xf32, #tpu.memory_space<vmem>>, vector<8x256xf32>,
    %c0_62 = arith.constant 0 : index
    %c0_63 = arith.constant 0 : index
    %73 = vector.load %arg9[%c0_62, %c0_63] : memref<8x401xf32, #tpu.memory_space<vmem>>, vector<8x401xf32>
    %c0_64 = arith.constant 0 : index
    %c0_65 = arith.constant 0 : index
    %74 = vector.load %arg6[%c0_64, %c0_65] : memref<8x1xf32, #tpu.memory_space<vmem>>, vector<8x1xf32>
    %75 = vector.shape_cast %74 : vector<8x1xf32> to vector<8x1xf32>
    %76 = vector.broadcast %75 : vector<8x1xf32> to vector<8x256xf32>
    %77 = vector.extract_strided_slice %73 {offsets = [0, 111], sizes = [8, 256], strides = [1, 1]} : vector<8x401xf32> to vector<8x256xf32>
    %78 = vector.broadcast %0 : vector<1x256xf32> to vector<8x256xf32>
    %79 = arith.mulf %77, %78 : vector<8x256xf32>
    %c0_66 = arith.constant 0 : index
    %c0_67 = arith.constant 0 : index
    %c0_68 = arith.constant 0 : index
    %c0_69 = arith.constant 0 : index
    %80 = vector.load %arg5[%c0_66, %c0_67, %c0_68, %c0_69] : memref<3x3x8x8xf32, #tpu.memory_space<vmem>>, vector<1x1x8x8xf32>
    %81 = vector.shape_cast %80 : vector<1x1x8x8xf32> to vector<8x8xf32>
    %cst_70 = arith.constant dense<0.000000e+00> : vector<8x256xf32>
    %82 = tpu.matmul %81, %79, %cst_70 {dimension_numbers = #tpu.dot_dimension_numbers<[1], [0], [0], [1], [0, 0, 1, 1], [], []>} : vector<8x8xf32>, vector<8x256xf32>, vector<8x256xf32> -> vector<8x256xf32>
    %83 = arith.addf %76, %82 : vector<8x256xf32>
    %84 = vector.extract_strided_slice %73 {offsets = [0, 112], sizes = [8, 256], strides = [1, 1]} : vector<8x401xf32> to vector<8x256xf32>
    %c0_71 = arith.constant 0 : index
    %c1_72 = arith.constant 1 : index
    %c0_73 = arith.constant 0 : index
    %c0_74 = arith.constant 0 : index
    %85 = vector.load %arg5[%c0_71, %c1_72, %c0_73, %c0_74] : memref<3x3x8x8xf32, #tpu.memory_space<vmem>>, vector<1x1x8x8xf32>
    %86 = vector.shape_cast %85 : vector<1x1x8x8xf32> to vector<8x8xf32>
    %cst_75 = arith.constant dense<0.000000e+00> : vector<8x256xf32>
    %87 = tpu.matmul %86, %84, %cst_75 {dimension_numbers = #tpu.dot_dimension_numbers<[1], [0], [0], [1], [0, 0, 1, 1], [], []>} : vector<8x8xf32>, vector<8x256xf32>, vector<8x256xf32> -> vector<8x256xf32>
    %88 = arith.addf %83, %87 : vector<8x256xf32>
    %89 = vector.extract_strided_slice %73 {offsets = [0, 113], sizes = [8, 256], strides = [1, 1]} : vector<8x401xf32> to vector<8x256xf32>
    %90 = vector.broadcast %1 : vector<1x256xf32> to vector<8x256xf32>
    %91 = arith.mulf %89, %90 : vector<8x256xf32>
    %c0_76 = arith.constant 0 : index
    %c2_77 = arith.constant 2 : index
    %c0_78 = arith.constant 0 : index
    %c0_79 = arith.constant 0 : index
    %92 = vector.load %arg5[%c0_76, %c2_77, %c0_78, %c0_79] : memref<3x3x8x8xf32, #tpu.memory_space<vmem>>, vector<1x1x8x8xf32>
    %93 = vector.shape_cast %92 : vector<1x1x8x8xf32> to vector<8x8xf32>
    %cst_80 = arith.constant dense<0.000000e+00> : vector<8x256xf32>
    %94 = tpu.matmul %93, %91, %cst_80 {dimension_numbers = #tpu.dot_dimension_numbers<[1], [0], [0], [1], [0, 0, 1, 1], [], []>} : vector<8x8xf32>, vector<8x256xf32>, vector<8x256xf32> -> vector<8x256xf32>
    %95 = arith.addf %88, %94 : vector<8x256xf32>
    %96 = vector.extract_strided_slice %73 {offsets = [0, 127], sizes = [8, 256], strides = [1, 1]} : vector<8x401xf32> to vector<8x256xf32>
    %97 = vector.broadcast %0 : vector<1x256xf32> to vector<8x256xf32>
    %98 = arith.mulf %96, %97 : vector<8x256xf32>
    %c1_81 = arith.constant 1 : index
    %c0_82 = arith.constant 0 : index
    %c0_83 = arith.constant 0 : index
    %c0_84 = arith.constant 0 : index
    %99 = vector.load %arg5[%c1_81, %c0_82, %c0_83, %c0_84] : memref<3x3x8x8xf32, #tpu.memory_space<vmem>>, vector<1x1x8x8xf32>
    %100 = vector.shape_cast %99 : vector<1x1x8x8xf32> to vector<8x8xf32>
    %cst_85 = arith.constant dense<0.000000e+00> : vector<8x256xf32>
    %101 = tpu.matmul %100, %98, %cst_85 {dimension_numbers = #tpu.dot_dimension_numbers<[1], [0], [0], [1], [0, 0, 1, 1], [], []>} : vector<8x8xf32>, vector<8x256xf32>, vector<8x256xf32> -> vector<8x256xf32>
    %102 = arith.addf %95, %101 : vector<8x256xf32>
    %103 = vector.extract_strided_slice %73 {offsets = [0, 128], sizes = [8, 256], strides = [1, 1]} : vector<8x401xf32> to vector<8x256xf32>
    %c1_86 = arith.constant 1 : index
    %c1_87 = arith.constant 1 : index
    %c0_88 = arith.constant 0 : index
    %c0_89 = arith.constant 0 : index
    %104 = vector.load %arg5[%c1_86, %c1_87, %c0_88, %c0_89] : memref<3x3x8x8xf32, #tpu.memory_space<vmem>>, vector<1x1x8x8xf32>
    %105 = vector.shape_cast %104 : vector<1x1x8x8xf32> to vector<8x8xf32>
    %cst_90 = arith.constant dense<0.000000e+00> : vector<8x256xf32>
    %106 = tpu.matmul %105, %103, %cst_90 {dimension_numbers = #tpu.dot_dimension_numbers<[1], [0], [0], [1], [0, 0, 1, 1], [], []>} : vector<8x8xf32>, vector<8x256xf32>, vector<8x256xf32> -> vector<8x256xf32>
    %107 = arith.addf %102, %106 : vector<8x256xf32>
    %108 = vector.extract_strided_slice %73 {offsets = [0, 129], sizes = [8, 256], strides = [1, 1]} : vector<8x401xf32> to vector<8x256xf32>
    %109 = vector.broadcast %1 : vector<1x256xf32> to vector<8x256xf32>
    %110 = arith.mulf %108, %109 : vector<8x256xf32>
    %c1_91 = arith.constant 1 : index
    %c2_92 = arith.constant 2 : index
    %c0_93 = arith.constant 0 : index
    %c0_94 = arith.constant 0 : index
    %111 = vector.load %arg5[%c1_91, %c2_92, %c0_93, %c0_94] : memref<3x3x8x8xf32, #tpu.memory_space<vmem>>, vector<1x1x8x8xf32>
    %112 = vector.shape_cast %111 : vector<1x1x8x8xf32> to vector<8x8xf32>
    %cst_95 = arith.constant dense<0.000000e+00> : vector<8x256xf32>
    %113 = tpu.matmul %112, %110, %cst_95 {dimension_numbers = #tpu.dot_dimension_numbers<[1], [0], [0], [1], [0, 0, 1, 1], [], []>} : vector<8x8xf32>, vector<8x256xf32>, vector<8x256xf32> -> vector<8x256xf32>
    %114 = arith.addf %107, %113 : vector<8x256xf32>
    %115 = vector.extract_strided_slice %73 {offsets = [0, 143], sizes = [8, 256], strides = [1, 1]} : vector<8x401xf32> to vector<8x256xf32>
    %116 = vector.broadcast %0 : vector<1x256xf32> to vector<8x256xf32>
    %117 = arith.mulf %115, %116 : vector<8x256xf32>
    %c2_96 = arith.constant 2 : index
    %c0_97 = arith.constant 0 : index
    %c0_98 = arith.constant 0 : index
    %c0_99 = arith.constant 0 : index
    %118 = vector.load %arg5[%c2_96, %c0_97, %c0_98, %c0_99] : memref<3x3x8x8xf32, #tpu.memory_space<vmem>>, vector<1x1x8x8xf32>
    %119 = vector.shape_cast %118 : vector<1x1x8x8xf32> to vector<8x8xf32>
    %cst_100 = arith.constant dense<0.000000e+00> : vector<8x256xf32>
    %120 = tpu.matmul %119, %117, %cst_100 {dimension_numbers = #tpu.dot_dimension_numbers<[1], [0], [0], [1], [0, 0, 1, 1], [], []>} : vector<8x8xf32>, vector<8x256xf32>, vector<8x256xf32> -> vector<8x256xf32>
    %121 = arith.addf %114, %120 : vector<8x256xf32>
    %122 = vector.extract_strided_slice %73 {offsets = [0, 144], sizes = [8, 256], strides = [1, 1]} : vector<8x401xf32> to vector<8x256xf32>
    %c2_101 = arith.constant 2 : index
    %c1_102 = arith.constant 1 : index
    %c0_103 = arith.constant 0 : index
    %c0_104 = arith.constant 0 : index
    %123 = vector.load %arg5[%c2_101, %c1_102, %c0_103, %c0_104] : memref<3x3x8x8xf32, #tpu.memory_space<vmem>>, vector<1x1x8x8xf32>
    %124 = vector.shape_cast %123 : vector<1x1x8x8xf32> to vector<8x8xf32>
    %cst_105 = arith.constant dense<0.000000e+00> : vector<8x256xf32>
    %125 = tpu.matmul %124, %122, %cst_105 {dimension_numbers = #tpu.dot_dimension_numbers<[1], [0], [0], [1], [0, 0, 1, 1], [], []>} : vector<8x8xf32>, vector<8x256xf32>, vector<8x256xf32> -> vector<8x256xf32>
    %126 = arith.addf %121, %125 : vector<8x256xf32>
    %127 = vector.extract_strided_slice %73 {offsets = [0, 145], sizes = [8, 256], strides = [1, 1]} : vector<8x401xf32> to vector<8x256xf32>
    %128 = vector.broadcast %1 : vector<1x256xf32> to vector<8x256xf32>
    %129 = arith.mulf %127, %128 : vector<8x256xf32>
    %c2_106 = arith.constant 2 : index
    %c2_107 = arith.constant 2 : index
    %c0_108 = arith.constant 0 : index
    %c0_109 = arith.constant 0 : index
    %130 = vector.load %arg5[%c2_106, %c2_107, %c0_108, %c0_109] : memref<3x3x8x8xf32, #tpu.memory_space<vmem>>, vector<1x1x8x8xf32>
    %131 = vector.shape_cast %130 : vector<1x1x8x8xf32> to vector<8x8xf32>
    %cst_110 = arith.constant dense<0.000000e+00> : vector<8x256xf32>
    %132 = tpu.matmul %131, %129, %cst_110 {dimension_numbers = #tpu.dot_dimension_numbers<[1], [0], [0], [1], [0, 0, 1, 1], [], []>} : vector<8x8xf32>, vector<8x256xf32>, vector<8x256xf32> -> vector<8x256xf32>
    %133 = arith.addf %126, %132 : vector<8x256xf32>
    %cst_111 = arith.constant 0.000000e+00 : f32
    %134 = vector.broadcast %cst_111 : f32 to vector<8x256xf32>
    %135 = arith.maximumf %133, %134 : vector<8x256xf32>
    %c0_112 = arith.constant 0 : index
    %c0_113 = arith.constant 0 : index
    %c0_114 = arith.constant 0 : index
    %136 = vector.load %arg7[%c0_112, %c0_113, %c0_114] : memref<1x8x256xf32, #tpu.memory_space<vmem>>, vector<1x8x256xf32>
    %137 = vector.shape_cast %136 : vector<1x8x256xf32> to vector<8x256xf32>
    %138 = vector.shape_cast %135 : vector<8x256xf32> to vector<1x8x256xf32>
    tpu.vector_store %arg7[%c0_112, %c0_113, %c0_114], %138 {strides = array<i32>} : memref<1x8x256xf32, #tpu.memory_space<vmem>>, vector<1x8x256xf32>,
    return
  }
  func.func @transform_0(%arg0: i32) -> (i32, i32, i32) {
    %c0_i32 = arith.constant 0 : i32
    %c0_i32_0 = arith.constant 0 : i32
    %c0_i32_1 = arith.constant 0 : i32
    return %arg0, %c0_i32, %c0_i32_0 : i32, i32, i32
  }
  func.func @transform_1(%arg0: i32) -> (i32, i32) {
    %c0_i32 = arith.constant 0 : i32
    %c0_i32_0 = arith.constant 0 : i32
    %c0_i32_1 = arith.constant 0 : i32
    return %c0_i32, %c0_i32_0 : i32, i32
  }
  func.func @transform_2(%arg0: i32) -> (i32, i32, i32, i32) {
    %c0_i32 = arith.constant 0 : i32
    %c0_i32_0 = arith.constant 0 : i32
    %c0_i32_1 = arith.constant 0 : i32
    %c0_i32_2 = arith.constant 0 : i32
    %c0_i32_3 = arith.constant 0 : i32
    return %c0_i32, %c0_i32_0, %c0_i32_1, %c0_i32_2 : i32, i32, i32, i32
  }
  func.func @transform_3(%arg0: i32) -> (i32, i32) {
    %c0_i32 = arith.constant 0 : i32
    %c0_i32_0 = arith.constant 0 : i32
    %c0_i32_1 = arith.constant 0 : i32
    return %c0_i32, %c0_i32_0 : i32, i32
  }
  func.func @transform_4(%arg0: i32) -> (i32, i32, i32, i32) {
    %c0_i32 = arith.constant 0 : i32
    %c0_i32_0 = arith.constant 0 : i32
    %c0_i32_1 = arith.constant 0 : i32
    %c0_i32_2 = arith.constant 0 : i32
    %c0_i32_3 = arith.constant 0 : i32
    return %c0_i32, %c0_i32_0, %c0_i32_1, %c0_i32_2 : i32, i32, i32, i32
  }
  func.func @transform_5(%arg0: i32) -> (i32, i32) {
    %c0_i32 = arith.constant 0 : i32
    %c0_i32_0 = arith.constant 0 : i32
    %c0_i32_1 = arith.constant 0 : i32
    return %c0_i32, %c0_i32_0 : i32, i32
  }
  func.func @transform_6(%arg0: i32) -> (i32, i32, i32) {
    %c0_i32 = arith.constant 0 : i32
    %c0_i32_0 = arith.constant 0 : i32
    %c0_i32_1 = arith.constant 0 : i32
    return %arg0, %c0_i32, %c0_i32_0 : i32, i32, i32
  }
}

</mosaic_0001>

<bundles_post_ra>
// kernel: a_call__.1
= control target key start
LH: loop header
LB: loop body
LE: loop exit
PB: predicated region body
PF: predicated region fallthrough
CT: control target
= control target key end

     0   :  { %11 = vsyncpa [#allocation5], 0  ;;  %s2764_s0 = inlined_call_operand.vmem [shape: f32[2,4,256], index: 0, kind: input, shape index: {}]   ;;  %s2765_s1 = inlined_call_operand.vmem [shape: f32[2,256], index: 1, kind: input, shape index: {}]   ;;  %s2766_s2 = inlined_call_operand.vmem [shape: f32[3,3,8,4], index: 2, kind: input, shape index: {}]   ;;  %s2767_s3 = inlined_call_operand.hbm [shape: f32[8,1], index: 3, kind: input, shape index: {}]   ;;  %s2768_s4 = inlined_call_operand.vmem [shape: f32[3,3,8,8], index: 4, kind: input, shape index: {}]   ;;  %s2769_s5 = inlined_call_operand.hbm [shape: f32[8,1], index: 5, kind: input, shape index: {}]   ;;  %s2770_s6 = inlined_call_operand.vmem [shape: f32[2,8,256], index: 6, kind: output, shape index: {}]  }
   0x1   :  { %12 = vsyncpa [#allocation7], 0  ;;  %s2373_s21 = smov 0  }
   0x2 LB: > { %s2379_s22 = sadd.s32 4294967295, %s2324_s21   ;;  %p2148_p0 = scmp.ge.s32.totalorder %s2324_s21, 1  ;;  %s2324_s21 = sphi %s2373_s21, %s18_s21  }
   0x3   : > { %p180_p1 = scmp.lt.s32.totalorder %s2324_s21, 3  ;;  %p2771_p2 = scmp.eq.s32.totalorder %s2379_s22, 0 }
   0x4   : > { %s2326_s24 = smov [#allocation4]   ;;  %s2327_s26 = smov [#allocation6]  }
   0x5   : > { %p2384_p3 = pnand %p2148_p0, %p180_p1  ;;  %s199_s25 = sshll.u32 %s2326_s24, 4  ;;  %s200_s25 = int_to_ptr.vmem [resolvable:$true] %s199_s25 }
   0x6   : > { %s213_s27 = sshll.u32 %s2327_s26, 4  ;;  %s2269_s29 = scalar_lea.vmem %s200_s25, 128  ;;  %s214_s27 = int_to_ptr.vmem [resolvable:$true] %s213_s27 }
   0x7   : > { %s2773_s23 = scalar_select %p2384_p3, 1, 0 }
   0x8   : > { %p2224_p4 = pneg %p2384_p3  ;;  %p2270_p7 = scmp.ne.s32.totalorder %s200_s25, %s2269_s29 }
   0x9   : > { %p2277_p10 = scmp.lt.s32.totalorder %s200_s25, %s200_s25  ;;  %p2278_p11 = scmp.lt.s32.totalorder %s2269_s29, %s2269_s29 }
   0xa   : > { %p2392_p5 = pnand %p2771_p2, %p2224_p4 }
   0xb   : > { %p2279_p12 = por %p2278_p11, %p2277_p10 }
   0xc   : > { %p2260_p6 = pneg %p2392_p5 }
   0xe   : > { %p2272_p8 = pnand %p2270_p7, %p2260_p6 }
  0x10   : > { %p2273_p9 = pneg %p2272_p8 }
  0x12   : > { %p2280_p13 = pnand %p2279_p12, %p2273_p9 }
  0x14   : > { %2283 = shalt.err (!%p2280_p13)
}
  0x15   : > { %2227 = dma.hbm_to_vmem [thread:$0]  (!%p2392_p5), %s2767_s3, 128, %s200_s25, [#allocation5]  }
  0x16   : > { %s2295_s8 = scalar_lea.vmem %s214_s27, 128  ;;  %p2303_p7 = scmp.lt.s32.totalorder %s214_s27, %s214_s27 }
  0x17   : > { %p2296_p0 = scmp.ne.s32.totalorder %s214_s27, %s2295_s8  ;;  %p2304_p8 = scmp.lt.s32.totalorder %s2295_s8, %s2295_s8 }
  0x19   : > { %p2298_p1 = pnand %p2296_p0, %p2260_p6  ;;  %p2305_p2 = por %p2304_p8, %p2303_p7 }
  0x1b   : > { %p2299_p4 = pneg %p2298_p1 }
  0x1d   : > { %p2306_p3 = pnand %p2305_p2, %p2299_p4 }
  0x1f   : > { %2309 = shalt.err (!%p2306_p3)
}
  0x20   : > { %2230 = dma.hbm_to_vmem [thread:$0]  (!%p2392_p5), %s2769_s5, 128, %s214_s27, [#allocation7]  }
  0x21   : > { %p2775_p9 = scmp.ne.s32.totalorder %s2773_s23, 0 }
  0x22   : > { %p2776_p10 = scmp.eq.s32.totalorder (!%p2775_p9), %s2379_s22, 0 }
  0x23   : > { %234 = sbr.rel (%p2775_p9) target bundleno = 870 (0x366), region = 44 }
  0x28   : > { %2315 = dma.done.wait (%p2776_p10), [#allocation5], 128   ;;  %p2777_p6 = pmov %p2776_p10 }
  0x2a   : > { %2317 = vsyncadd (%p2777_p6), [#allocation5], 4294967168  ;;  %p2778_p11 = pmov %p2777_p6 }
  0x2b   : > { %p2779_p2 = pmov %p2777_p6 }
  0x2c   : > { %2319 = dma.done.wait (%p2778_p11), [#allocation7], 128  }
  0x2d   : > { %2321 = vsyncadd (%p2779_p2), [#allocation7], 4294967168  ;;  %v297_v0 = vlaneseq  ;;  %vm282_vm0 = vcmask 1043456   ;;  %p268_p3 = scmp.lt.s32.totalorder %s2379_s22, 1  ;;  %v2328_v1 = vmov 0.0   ;;  %vm283_vm1 = vcmask 138244  }
  0x2e   : > { %281 = vst [vmem:[#allocation2] sm:$0xff] %v2328_v1  ;;  %494 = vmatprep.mubr.f32.mxu1 %v2328_v1  ;;  %400 = vmatprep.mubr.f32.mxu0 %v2328_v1  ;;  %vm284_vm2 = vmor %vm283_vm1, %vm282_vm0  ;;  %v278_v5 = vld [vmem:[%s2765_s1] ss:$2 sm:$0x3]  ;;  %s2329_s19 = smov 127   ;;  %s2330_s20 = smov 111  }
  0x2f   : > { %v298_v2 = vshrl.u32 %v297_v0, 7  ;;  %s2781_s22 = smov (!%p268_p3, %s2379_s22), 1  ;;  %285 = vst.msk [vmem:[#allocation2 + $0x8] sm:$0xff] %vm284_vm2, %v2328_v1  ;;  %v2159_v6 = vld [vmem:[%s2765_s1 + $0x1] ss:$2 sm:$0x3] }
  0x30   : > { %s2214_s11 = sshll.u32 %s2781_s22, 3  ;;  %s2331_s23 = smov 113   ;;  %vm309_vm3 = vcmask 908288   ;;  %vm619_vm4 = vcmask 1039360   ;;  %vm516_vm5 = vcmask 924672   ;;  %vm325_vm6 = vcmask 138240  }
  0x31   : > { %v299_v3 = vsub.s32 0, %v298_v2  ;;  %v303_v4 = vsub.s32 1, %v298_v2  ;;  %s272_s14 = scalar_lea.vmem %s2764_s0, %s2214_s11  ;;  %s2332_s24 = smov 16   ;;  %1182 = vst.msk [vmem:[#allocation3 + $0x18] sm:$0xff] %vm325_vm6, %v2328_v1  ;;  %vm420_vm7 = vcmask 130048   ;;  %vm328_vm8 = vcmask 31744  }
  0x32   : > { %v286_v11 = vld [vmem:[%s272_s14] sm:$0xff]  ;;  %s2333_s25 = smov 1   ;;  %s2334_s26 = smov 17   ;;  %v2163_v40 = vld [vmem:[%s2766_s2 + $0x8] sm:$0xff]  ;;  %v2336_v43 = vmov 0   ;;  %v290_v44 = vld [vmem:[#allocation4] sm:$0xff] }
  0x33   : > { %v2443_v7 = vrot.slane %v278_v5, %v299_v3  ;;  %v2445_v8 = vrot.slane %v278_v5, %v303_v4  ;;  %v2447_v9 = vrot.slane %v2159_v6, %v299_v3  ;;  %v2449_v10 = vrot.slane %v2159_v6, %v303_v4  ;;  %287 = vst [vmem:[#allocation2 + $0x4] sm:$0xff] %v286_v11  ;;  %s2335_s27 = smov 15   ;;  %s2337_s30 = smov 112   ;;  %v315_v6 = vld [vmem:[%s2766_s2] sm:$0xff] }
  0x34   : > { %2255 = vset.pattern.permute.xlu0 %v2336_v43  ;;  %vm636_vm9 = vcmask 7168   ;;  %vm533_vm10 = vcmask 121856   ;;  %vm1000_vm11 = vcmask 916480   ;;  %vm1220_vm12 = vcmask 64512   ;;  %s2215_s28 = sshll.u32 %s2781_s22, 4 }
  0x35   : > { %v2453_v12 = vcombine.low %v2443_v7, %v2445_v8  ;;  %v2461_v13 = vcombine.low %v2447_v9, %v2449_v10  ;;  %s277_s8 = scalar_lea.vmem %s2770_s6, %s2215_s28 }
  0x37   : > { %616 = vrot.lane.b32.xlu1 %v2453_v12, %s2329_s19  ;;  %306 = vrot.lane.b32.xlu0 %v2453_v12, %s2330_s20 }
  0x38   : > { %v2628_v43 = vld [vmem:[#allocation3 + $0x18] sm:$0xff] }
  0x3a   : > { %v2465_v14 = vld [vmem:[#allocation2 + $0x8] sm:$0xff]  ;;  %v288_v15 = vld [vmem:[#allocation2] sm:$0xff] }
  0x3b   : > { %513 = vrot.lane.b32.xlu0 %v2461_v13, %s2331_s23  ;;  %418 = vrot.lane.b32.xlu1 %v2465_v14, %s2332_s24  ;;  %v2473_v16 = vcombine.high %v288_v15, %v288_v15  ;;  %v993_v42 = vcombine.high %v2465_v14, %v2465_v14 }
  0x3f   : > { %414 = vrot.lane.b32.xlu0 %v288_v15, %s2332_s24  ;;  %801 = vrot.lane.b32.xlu1 %v288_v15, %s2329_s19 }
  0x43   : > { %803 = vrot.lane.b32.xlu0 %v2465_v14, %s2329_s19  ;;  %898 = vrot.lane.b32.xlu1 %v2465_v14, %s2331_s23 }
  0x47   : > { %416 = vrot.lane.b32.xlu0 %v2473_v16, %s2332_s24 }
  0x4b   : > { %896 = vrot.lane.b32.xlu0 %v288_v15, %s2331_s23 }
  0xa9   : > { %v617_v17 = vpop.permute.xlu1 %616  ;;  %v307_v18 = vpop.permute.xlu0 %306 }
  0xaa   : > { %v618_v19 = vrot.slane %v617_v17, 4  ;;  %v308_v20 = vrot.slane %v307_v18, 4 }
  0xac   : > { %v624_v21 = vmul.f32 %v618_v19, %v2465_v14  ;;  %v314_v22 = vmul.f32 %v308_v20, %v2465_v14  ;;  %v310_v23 = vsel %vm309_vm3, %v308_v20, %v307_v18  ;;  %v620_v28 = vsel %vm619_vm4, %v618_v19, %v617_v17  ;;  %v2167_v18 = vld [vmem:[%s2766_s2 + $0x10] sm:$0xff]  ;;  %v2179_v19 = vld [vmem:[%s2766_s2 + $0x28] sm:$0xff] }
  0xad   : > { %v514_v24 = vpop.permute.xlu0 %513  ;;  %v313_v26 = vmul.f32 %v310_v23, %v288_v15  ;;  %v623_v31 = vmul.f32 %v620_v28, %v288_v15  ;;  %v419_v36 = vpop.permute.xlu1 %418  ;;  %v2175_v23 = vld [vmem:[%s2766_s2 + $0x20] sm:$0xff]  ;;  %v2183_v28 = vld [vmem:[%s2766_s2 + $0x30] sm:$0xff] }
  0xae   : > { %v515_v25 = vrot.slane %v514_v24, 4  ;;  %634 = vrot.lane.b32.xlu1 %v624_v21, %s2333_s25  ;;  %323 = vrot.lane.b32.xlu0 %v314_v22, %s2334_s26 }
  0xaf   : > { %v629_v34 = vcombine.high %v623_v31, %v623_v31  ;;  %v318_v35 = vcombine.high %v313_v26, %v313_v26 }
  0xb0   : > { %v521_v27 = vmul.f32 %v515_v25, %v2465_v14  ;;  %v517_v29 = vsel %vm516_vm5, %v515_v25, %v514_v24 }
  0xb1   : > { %v415_v30 = vpop.permute.xlu0 %414  ;;  %v520_v32 = vmul.f32 %v517_v29, %v288_v15  ;;  %v802_v45 = vpop.permute.xlu1 %801 }
  0xb2   : > { %319 = vrot.lane.b32.xlu1 %v313_v26, %s2334_s26  ;;  %531 = vrot.lane.b32.xlu0 %v521_v27, %s2335_s27  ;;  %v805_v49 = vrot.slane %v802_v45, 4 }
  0xb3   : > { %v526_v41 = vcombine.high %v520_v32, %v520_v32 }
  0xb5   : > { %v804_v33 = vpop.permute.xlu0 %803  ;;  %v899_v46 = vpop.permute.xlu1 %898 }
  0xb6   : > { %630 = vrot.lane.b32.xlu0 %v623_v31, %s2333_s25  ;;  %527 = vrot.lane.b32.xlu1 %v520_v32, %s2335_s27  ;;  %v806_v48 = vrot.slane %v804_v33, 4  ;;  %v901_v55 = vrot.slane %v899_v46, 4  ;;  %v2191_v32 = vld [vmem:[%s2766_s2 + $0x40] sm:$0xff] }
  0xb8   : > { %v807_v52 = vsel %vm282_vm0, %v805_v49, %v806_v48 }
  0xb9   : > { %v417_v37 = vpop.permute.xlu0 %416  ;;  %v808_v57 = vsel %vm619_vm4, %v807_v52, %v804_v33 }
  0xba   : > { %632 = vrot.lane.b32.xlu0 %v629_v34, %s2333_s25  ;;  %321 = vrot.lane.b32.xlu1 %v318_v35, %s2334_s26  ;;  %v422_v38 = vsel %vm420_vm7, %v417_v37, %v419_v36  ;;  %v421_v39 = vsel %vm420_vm7, %v415_v30, %v417_v37  ;;  %v811_v61 = vmul.f32 %v808_v57, %v2461_v13 }
  0xbb   : > { %2164 = vmatprep.subr.msk.mxu1 %vm282_vm0, %v422_v38 }
  0xbc   : > { %2165 = vmatpush1.msk.msra.mxu1 %vm282_vm0, %v421_v39 }
  0xbd   : > { %2166 = vmatmul.mubr.msk.f32.vlgmr.msra.gmra.mxu1 %vm328_vm8, %v2163_v40  ;;  %v897_v47 = vpop.permute.xlu0 %896 }
  0xbe   : > { %529 = vrot.lane.b32.xlu1 %v526_v41, %s2335_s27  ;;  %1085 = vrot.lane.b32.xlu0 %v2465_v14, %s2330_s20  ;;  %v900_v56 = vrot.slane %v897_v47, 4 }
  0xbf   : > { %710 = vmatprep.mubr.f32.mxu1 %v2328_v1 }
  0xc0   : > { %v902_v60 = vsel %vm282_vm0, %v900_v56, %v901_v55 }
  0xc1   : > { %v903_v62 = vsel %vm516_vm5, %v902_v60, %v899_v46 }
  0xc2   : > { %1083 = vrot.lane.b32.xlu1 %v288_v15, %s2330_s20  ;;  %998 = vrot.lane.b32.xlu0 %v993_v42, %s2337_s30 }
  0xc6   : > { %996 = vrot.lane.b32.xlu1 %v2465_v14, %s2337_s30  ;;  %293 = vperm.xlu0 %2255, %v290_v44  }
  0xca   : > { %994 = vrot.lane.b32.xlu1 %v2473_v16, %s2337_s30  ;;  %1388 = vrot.lane.b32.xlu0 %v2447_v9, %s2331_s23 }
  0xce   : > { %1195 = vrot.lane.b32.xlu1 %v2443_v7, %s2330_s20  ;;  %1490 = vrot.lane.b32.xlu0 %v2443_v7, %s2329_s19 }
  0xd2   : > { %1197 = vrot.lane.b32.xlu1 %v2445_v8, %s2330_s20  ;;  %1670 = vrot.lane.b32.xlu0 %v2447_v9, %s2333_s25 }
  0xd6   : > { %1390 = vrot.lane.b32.xlu1 %v2449_v10, %s2331_s23  ;;  %1772 = vrot.lane.b32.xlu0 %v2443_v7, %s2335_s27  ;;  %v815_v7 = vcombine.high %v811_v61, %v811_v61 }
  0xda   : > { %1492 = vrot.lane.b32.xlu1 %v2445_v8, %s2329_s19  ;;  %1963 = vrot.lane.b32.xlu0 %v2447_v9, %s2334_s26  ;;  %v906_v9 = vmul.f32 %v903_v62, %v2453_v12 }
  0xdc   : > { %v910_v21 = vcombine.high %v906_v9, %v906_v9 }
  0xde   : > { %1672 = vrot.lane.b32.xlu1 %v2449_v10, %s2333_s25 }
  0xe2   : > { %1774 = vrot.lane.b32.xlu1 %v2445_v8, %s2335_s27  ;;  %v2171_v8 = vld [vmem:[%s2766_s2 + $0x18] sm:$0xff] }
  0xe6   : > { %1965 = vrot.lane.b32.xlu1 %v2449_v10, %s2334_s26 }
  0xea   : > { %1302 = vrot.lane.b32.xlu1 %v2328_v1, %s2332_s24 }
 0x120   : > { %v635_v50 = vpop.permute.xlu1 %634  ;;  %v324_v51 = vpop.permute.xlu0 %323 }
 0x124   : > { %v320_v53 = vpop.permute.xlu1 %319  ;;  %v532_v54 = vpop.permute.xlu0 %531 }
 0x128   : > { %v528_v58 = vpop.permute.xlu1 %527  ;;  %v631_v59 = vpop.permute.xlu0 %630 }
 0x12c   : > { %v322_v63 = vpop.permute.xlu1 %321  ;;  %v633_v0 = vpop.permute.xlu0 %632 }
 0x12d   : > { %v637_v2 = vsel %vm636_vm9, %v631_v59, %v633_v0  ;;  %v638_v3 = vsel %vm636_vm9, %v633_v0, %v635_v50  ;;  %v327_v4 = vsel %vm325_vm6, %v322_v63, %v324_v51  ;;  %v326_v5 = vsel %vm325_vm6, %v320_v53, %v322_v63 }
 0x12e   : > { %2160 = vmatprep.subr.msk.mxu0 %vm282_vm0, %v327_v4  ;;  %2172 = vmatprep.subr.msk.mxu1 %vm282_vm0, %v638_v3 }
 0x12f   : > { %2161 = vmatpush1.msk.msra.mxu0 %vm282_vm0, %v326_v5  ;;  %2173 = vmatpush1.msk.msra.mxu1 %vm282_vm0, %v637_v2 }
 0x130   : > { %v530_v10 = vpop.permute.xlu1 %529  ;;  %2162 = vmatmul.mubr.msk.f32.vlgmr.msra.gmra.mxu0 %vm328_vm8, %v315_v6  ;;  %2180 = vmatprep.subr.msk.mxu1 %vm282_vm0, %v815_v7  ;;  %v1086_v11 = vpop.permute.xlu0 %1085 }
 0x131   : > { %v534_v15 = vsel %vm533_vm10, %v528_v58, %v530_v10  ;;  %v535_v17 = vsel %vm533_vm10, %v530_v10, %v532_v54  ;;  %2174 = vmatmul.mubr.msk.f32.vlgmr.msra.gmra.mxu1 %vm328_vm8, %v2171_v8  ;;  %607 = vmatprep.mubr.f32.mxu0 %v2328_v1  ;;  %v1088_v12 = vrot.slane %v1086_v11, 4 }
 0x132   : > { %2181 = vmatpush1.msk.msra.mxu1 %vm282_vm0, %v811_v61  ;;  %2168 = vmatprep.subr.msk.mxu0 %vm282_vm0, %v535_v17 }
 0x133   : > { %2169 = vmatpush1.msk.msra.mxu0 %vm282_vm0, %v534_v15  ;;  %887 = vmatprep.mubr.f32.mxu1 %v2328_v1 }
 0x134   : > { %v1084_v20 = vpop.permute.xlu1 %1083  ;;  %2170 = vmatmul.mubr.msk.f32.vlgmr.msra.gmra.mxu0 %vm328_vm8, %v2167_v18  ;;  %2176 = vmatprep.subr.msk.mxu0 %vm282_vm0, %v2465_v14  ;;  %v999_v24 = vpop.permute.xlu0 %998 }
 0x135   : > { %v1087_v22 = vrot.slane %v1084_v20, 4  ;;  %2177 = vmatpush1.msk.msra.mxu0 %vm282_vm0, %v2473_v16  ;;  %792 = vmatprep.mubr.f32.mxu0 %v2328_v1 }
 0x136   : > { %2184 = vmatprep.subr.msk.mxu0 %vm282_vm0, %v910_v21  ;;  %2182 = vmatmul.mubr.msk.f32.vlgmr.msra.gmra.mxu1 %vm328_vm8, %v2179_v19 }
 0x137   : > { %v1089_v25 = vsel %vm282_vm0, %v1087_v22, %v1088_v12  ;;  %1074 = vmatprep.mubr.f32.mxu1 %v2328_v1 }
 0x138   : > { %v1090_v14 = vsel %vm309_vm3, %v1089_v25, %v1086_v11  ;;  %v997_v26 = vpop.permute.xlu1 %996  ;;  %2178 = vmatmul.mubr.msk.f32.vlgmr.msra.gmra.mxu0 %vm328_vm8, %v2175_v23 }
 0x139   : > { %v1092_v16 = vmul.f32 %v1090_v14, %v2461_v13  ;;  %2185 = vmatpush1.msk.msra.mxu0 %vm282_vm0, %v906_v9  ;;  %v1002_v27 = vsel %vm1000_vm11, %v997_v26, %v999_v24  ;;  %982 = vmatprep.mubr.f32.mxu0 %v2328_v1  ;;  %v2187_v13 = vld [vmem:[%s2766_s2 + $0x38] sm:$0xff] }
 0x13a   : > { %2188 = vmatprep.subr.msk.mxu1 %vm282_vm0, %v1002_v27 }
 0x13b   : > { %v1096_v29 = vcombine.high %v1092_v16, %v1092_v16 }
 0x13c   : > { %v995_v30 = vpop.permute.xlu1 %994  ;;  %2186 = vmatmul.mubr.msk.f32.vlgmr.msra.gmra.mxu0 %vm328_vm8, %v2183_v28 }
 0x13d   : > { %v1001_v31 = vsel %vm1000_vm11, %v995_v30, %v997_v26  ;;  %2192 = vmatprep.subr.msk.mxu0 %vm282_vm0, %v1096_v29  ;;  %1168 = vmatprep.mubr.f32.mxu0 %v2328_v1 }
 0x13e   : > { %2189 = vmatpush1.msk.msra.mxu1 %vm282_vm0, %v1001_v31  ;;  %2193 = vmatpush1.msk.msra.mxu0 %vm282_vm0, %v1092_v16 }
 0x13f   : > { %2190 = vmatmul.mubr.msk.f32.vlgmr.msra.gmra.mxu1 %vm328_vm8, %v2187_v13 }
 0x140   : > { %2194 = vmatmul.mubr.msk.f32.vlgmr.msra.gmra.mxu0 %vm328_vm8, %v2191_v32  ;;  %1288 = vmatprep.mubr.f32.mxu1 %v2328_v1  ;;  %v1196_v33 = vpop.permute.xlu1 %1195 }
 0x141   : > { %1379 = vmatprep.mubr.f32.mxu0 %v2328_v1  ;;  %v1203_v34 = vmul.f32 0.0, %v1196_v33  ;;  %v294_v35 = vpop.permute.xlu0 %293 }
 0x143   : > { %1210 = vrot.lane.b32.xlu0 %v1203_v34, %s2334_s26 }
 0x144   : > { %v2618_v36 = vpop.permute.xlu1 %1197 }
 0x145   : > { %v2622_v38 = vpop.permute.xlu0 %1388  ;;  %v1199_v14 = vsel %vm309_vm3, %v1196_v33, %v2618_v36 }
 0x146   : > { %v1396_v42 = vmul.f32 0.0, %v2622_v38 }
 0x148   : > { %v2620_v37 = vpop.permute.xlu1 %1390  ;;  %1404 = vrot.lane.b32.xlu0 %v1396_v42, %s2335_s27 }
 0x149   : > { %v1491_v40 = vpop.permute.xlu0 %1490  ;;  %v1392_v13 = vsel %vm516_vm5, %v2622_v38, %v2620_v37 }
 0x14a   : > { %v1498_v41 = vmul.f32 0.0, %v1491_v40 }
 0x14c   : > { %v2624_v39 = vpop.permute.xlu1 %1492  ;;  %1506 = vrot.lane.b32.xlu1 %v1498_v41, %s2333_s25 }
 0x14d   : > { %v1671_v25 = vpop.permute.xlu0 %1670  ;;  %v1494_v16 = vsel %vm619_vm4, %v1491_v40, %v2624_v39 }
 0x150   : > { %v2630_v44 = vpop.permute.xlu1 %1672 }
 0x151   : > { %v1680_v45 = vmul.f32 %v2630_v44, %v2628_v43  ;;  %v1773_v29 = vpop.permute.xlu0 %1772  ;;  %v1674_v42 = vsel %vm636_vm9, %v1671_v25, %v2630_v44  ;;  %v1189_v44 = vld [vmem:[#allocation6] sm:$0xff] }
 0x153   : > { %1690 = vrot.lane.b32.xlu1 %v1680_v45, %s2329_s19 }
 0x154   : > { %v2636_v46 = vpop.permute.xlu1 %1774 }
 0x155   : > { %v1782_v47 = vmul.f32 %v2636_v46, %v2628_v43 }
 0x157   : > { %1792 = vrot.lane.b32.xlu0 %v1782_v47, %s2331_s23 }
 0x158   : > { %v1966_v38 = vpop.permute.xlu1 %1965 }
 0x17d   : > { %v496_v48 = vpop.f32.mrf.mxu1 }
 0x17f   : > { %v498_v49 = vpop.f32.mrf.mxu1 }
 0x1f0   : > { %v402_v50 = vpop.f32.mrf.mxu0 }
 0x1f1   : > { %v407_v51 = vadd.f32 %v402_v50, %v294_v35  ;;  %v712_v52 = vpop.f32.mrf.mxu1 }
 0x1f2   : > { %v404_v53 = vpop.f32.mrf.mxu0 }
 0x1f3   : > { %v408_v54 = vadd.f32 %v404_v53, %v294_v35  ;;  %v501_v55 = vadd.f32 %v496_v48, %v407_v51  ;;  %v714_v56 = vpop.f32.mrf.mxu1  ;;  %v1964_v35 = vpop.permute.xlu0 %1963 }
 0x1f4   : > { %v609_v57 = vpop.f32.mrf.mxu0  ;;  %v1967_v41 = vsel %vm325_vm6, %v1964_v35, %v1966_v38  ;;  %v1303_v48 = vpop.permute.xlu1 %1302 }
 0x1f5   : > { %v502_v58 = vadd.f32 %v498_v49, %v408_v54  ;;  %v614_v59 = vadd.f32 %v609_v57, %v501_v55 }
 0x1f6   : > { %v611_v60 = vpop.f32.mrf.mxu0  ;;  %v889_v61 = vpop.f32.mrf.mxu1 }
 0x1f7   : > { %v717_v62 = vadd.f32 %v712_v52, %v614_v59  ;;  %v615_v63 = vadd.f32 %v611_v60, %v502_v58  ;;  %v1211_v49 = vpop.permute.xlu0 %1210 }
 0x1f8   : > { %v794_v0 = vpop.f32.mrf.mxu0  ;;  %v891_v5 = vpop.f32.mrf.mxu1 }
 0x1f9   : > { %v718_v2 = vadd.f32 %v714_v56, %v615_v63  ;;  %v799_v3 = vadd.f32 %v794_v0, %v717_v62  ;;  %v1507_v50 = vpop.permute.xlu1 %1506  ;;  %v1206_v0 = vld [vmem:[%s2768_s4] sm:$0xff] }
 0x1fa   : > { %v796_v4 = vpop.f32.mrf.mxu0 }
 0x1fb   : > { %v894_v6 = vadd.f32 %v889_v61, %v799_v3  ;;  %v800_v7 = vadd.f32 %v796_v4, %v718_v2  ;;  %v1405_v51 = vpop.permute.xlu0 %1404 }
 0x1fc   : > { %v984_v8 = vpop.f32.mrf.mxu0 }
 0x1fd   : > { %v895_v9 = vadd.f32 %v891_v5, %v800_v7  ;;  %v989_v10 = vadd.f32 %v984_v8, %v894_v6  ;;  %v1691_v52 = vpop.permute.xlu1 %1690  ;;  %v2198_v6 = vld [vmem:[%s2768_s4 + $0x10] sm:$0xff] }
 0x1fe   : > { %v986_v11 = vpop.f32.mrf.mxu0 }
 0x1ff   : > { %v990_v15 = vadd.f32 %v986_v11, %v895_v9  ;;  %v1076_v17 = vpop.f32.mrf.mxu1  ;;  %v1793_v53 = vpop.permute.xlu0 %1792 }
 0x200   : > { %v1081_v18 = vadd.f32 %v1076_v17, %v989_v10  ;;  %v1170_v12 = vpop.f32.mrf.mxu0  ;;  %v2202_v10 = vld [vmem:[%s2768_s4 + $0x20] sm:$0xff] }
 0x201   : > { %v1078_v19 = vpop.f32.mrf.mxu1 }
 0x202   : > { %v1175_v20 = vadd.f32 %v1170_v12, %v1081_v18  ;;  %v1082_v21 = vadd.f32 %v1078_v19, %v990_v15  ;;  %v1172_v22 = vpop.f32.mrf.mxu0  ;;  %v2200_v18 = vld [vmem:[%s2768_s4 + $0x18] sm:$0xff] }
 0x204   : > { %v2641_v23 = vmax.f32 %v1175_v20, 0.0  ;;  %v1176_v24 = vadd.f32 %v1172_v22, %v1082_v21  ;;  %v2206_v21 = vld [vmem:[%s2768_s4 + $0x30] sm:$0xff] }
 0x206   : > { %v2645_v26 = vmax.f32 %v1176_v24, 0.0  ;;  %1304 = vrot.lane.b32.xlu1 %v2641_v23, %s2332_s24  ;;  %v1204_v27 = vmul.f32 %v1199_v14, %v2641_v23  ;;  %v1499_v28 = vmul.f32 %v1494_v16, %v2641_v23  ;;  %v1780_v30 = vmul.f32 %v1773_v29, %v2641_v23  ;;  %v2204_v14 = vld [vmem:[%s2768_s4 + $0x28] sm:$0xff] }
 0x207   : > { %v1397_v31 = vmul.f32 %v1392_v13, %v2641_v23  ;;  %v1678_v33 = vmul.f32 %v1671_v25, %v2641_v23 }
 0x208   : > { %1212 = vrot.lane.b32.xlu0 %v1204_v27, %s2334_s26  ;;  %v1205_v32 = vmul.f32 %v2618_v36, %v2645_v26  ;;  %v1398_v34 = vmul.f32 %v2620_v37, %v2645_v26  ;;  %v1776_v36 = vsel %vm533_vm10, %v1773_v29, %v2636_v46  ;;  %v1500_v40 = vmul.f32 %v2624_v39, %v2645_v26 }
 0x209   : > { %v1781_v37 = vmul.f32 %v1776_v36, %v2645_v26  ;;  %v1679_v45 = vmul.f32 %v1674_v42, %v2645_v26  ;;  %v1972_v47 = vmul.f32 %v1967_v41, %v2645_v26  ;;  %v1971_v39 = vmul.f32 %v1964_v35, %v2641_v23 }
 0x20a   : > { %1508 = vrot.lane.b32.xlu1 %v1499_v28, %s2333_s25  ;;  %v1973_v46 = vmul.f32 %v1966_v38, %v2628_v43  ;;  %v2208_v28 = vld [vmem:[%s2768_s4 + $0x38] sm:$0xff] }
 0x20c   : > { %1306 = vrot.lane.b32.xlu0 %v2645_v26, %s2332_s24 }
 0x20e   : > { %1788 = vrot.lane.b32.xlu1 %v1780_v30, %s2331_s23 }
 0x210   : > { %1406 = vrot.lane.b32.xlu0 %v1397_v31, %s2335_s27  ;;  %v2210_v31 = vld [vmem:[%s2768_s4 + $0x40] sm:$0xff] }
 0x212   : > { %1214 = vrot.lane.b32.xlu1 %v1205_v32, %s2334_s26 }
 0x214   : > { %1686 = vrot.lane.b32.xlu0 %v1678_v33, %s2329_s19 }
 0x216   : > { %1408 = vrot.lane.b32.xlu1 %v1398_v34, %s2335_s27 }
 0x218   : > { %1879 = vrot.lane.b32.xlu0 %v2645_v26, %s2337_s30 }
 0x21a   : > { %1881 = vrot.lane.b32.xlu1 %v2628_v43, %s2337_s30  ;;  %v2196_v43 = vld [vmem:[%s2768_s4 + $0x8] sm:$0xff] }
 0x21c   : > { %1510 = vrot.lane.b32.xlu0 %v1500_v40, %s2333_s25 }
 0x21e   : > { %1790 = vrot.lane.b32.xlu1 %v1781_v37, %s2331_s23 }
 0x220   : > { %1688 = vrot.lane.b32.xlu0 %v1679_v45, %s2329_s19 }
 0x222   : > { %1981 = vrot.lane.b32.xlu1 %v1972_v47, %s2330_s20 }
 0x224   : > { %1877 = vrot.lane.b32.xlu0 %v2641_v23, %s2337_s30 }
 0x226   : > { %1979 = vrot.lane.b32.xlu1 %v1971_v39, %s2330_s20 }
 0x228   : > { %1983 = vrot.lane.b32.xlu0 %v1973_v46, %s2330_s20 }
 0x22c   : > { %1192 = vperm.xlu0 %2255, %v1189_v44  }
 0x278   : > { %v1305_v54 = vpop.permute.xlu1 %1304 }
 0x279   : > { %v1308_v60 = vsel %vm420_vm7, %v1303_v48, %v1305_v54 }
 0x27a   : > { %v1213_v55 = vpop.permute.xlu0 %1212 }
 0x27b   : > { %v1216_v2 = vsel %vm325_vm6, %v1211_v49, %v1213_v55 }
 0x27c   : > { %v1509_v56 = vpop.permute.xlu1 %1508 }
 0x27d   : > { %v1512_v12 = vsel %vm636_vm9, %v1507_v50, %v1509_v56 }
 0x27e   : > { %v1307_v57 = vpop.permute.xlu0 %1306 }
 0x27f   : > { %v1309_v59 = vsel %vm420_vm7, %v1305_v54, %v1307_v57 }
 0x280   : > { %v1789_v58 = vpop.permute.xlu1 %1788  ;;  %1345 = vmatprep.subr.mxu0 %v1309_v59 }
 0x281   : > { %1346 = vmatpush1.msra.mxu0 %v1308_v60 }
 0x282   : > { %v1407_v61 = vpop.permute.xlu0 %1406  ;;  %2197 = vmatmul.mubr.msk.f32.vlgmr.msra.gmra.mxu0 %vm1220_vm12, %v2196_v43 }
 0x283   : > { %1583 = vmatprep.mubr.f32.mxu0 %v2328_v1  ;;  %v1410_v7 = vsel %vm533_vm10, %v1405_v51, %v1407_v61 }
 0x284   : > { %v1215_v62 = vpop.permute.xlu1 %1214 }
 0x285   : > { %v1217_v63 = vsel %vm325_vm6, %v1213_v55, %v1215_v62 }
 0x286   : > { %1254 = vmatprep.subr.mxu1 %v1217_v63  ;;  %v1687_v3 = vpop.permute.xlu0 %1686 }
 0x287   : > { %1255 = vmatpush1.msra.mxu1 %v1216_v2 }
 0x288   : > { %v1409_v4 = vpop.permute.xlu1 %1408  ;;  %2195 = vmatmul.mubr.msk.f32.vlgmr.msra.gmra.mxu1 %vm1220_vm12, %v1206_v0 }
 0x289   : > { %v1411_v5 = vsel %vm533_vm10, %v1407_v61, %v1409_v4  ;;  %1481 = vmatprep.mubr.f32.mxu1 %v2328_v1 }
 0x28a   : > { %1447 = vmatprep.subr.mxu1 %v1411_v5  ;;  %v1880_v8 = vpop.permute.xlu0 %1879 }
 0x28b   : > { %1448 = vmatpush1.msra.mxu1 %v1410_v7 }
 0x28c   : > { %v1882_v9 = vpop.permute.xlu1 %1881  ;;  %2199 = vmatmul.mubr.msk.f32.vlgmr.msra.gmra.mxu1 %vm1220_vm12, %v2198_v6  ;;  %1627 = vmatprep.subr.mxu1 %v2645_v26 }
 0x28d   : > { %1628 = vmatpush1.msra.mxu1 %v2641_v23  ;;  %1661 = vmatprep.mubr.f32.mxu1 %v2328_v1  ;;  %v1884_v26 = vsel %vm1000_vm11, %v1880_v8, %v1882_v9 }
 0x28e   : > { %v1511_v11 = vpop.permute.xlu0 %1510 }
 0x28f   : > { %v1513_v17 = vsel %vm636_vm9, %v1509_v56, %v1511_v11 }
 0x290   : > { %v1791_v15 = vpop.permute.xlu1 %1790  ;;  %2203 = vmatmul.mubr.msk.f32.vlgmr.msra.gmra.mxu1 %vm1220_vm12, %v2202_v10  ;;  %1549 = vmatprep.subr.mxu0 %v1513_v17 }
 0x291   : > { %v1794_v19 = vsel %vm516_vm5, %v1789_v58, %v1791_v15  ;;  %v1795_v20 = vsel %vm516_vm5, %v1791_v15, %v1793_v53  ;;  %1865 = vmatprep.mubr.f32.mxu1 %v2328_v1  ;;  %1550 = vmatpush1.msra.mxu0 %v1512_v12 }
 0x292   : > { %1831 = vmatprep.subr.mxu1 %v1795_v20  ;;  %2201 = vmatmul.mubr.msk.f32.vlgmr.msra.gmra.mxu0 %vm1220_vm12, %v2200_v18  ;;  %v1689_v22 = vpop.permute.xlu0 %1688 }
 0x293   : > { %1832 = vmatpush1.msra.mxu1 %v1794_v19  ;;  %v1692_v23 = vsel %vm619_vm4, %v1687_v3, %v1689_v22  ;;  %v1693_v25 = vsel %vm619_vm4, %v1689_v22, %v1691_v52  ;;  %1763 = vmatprep.mubr.f32.mxu0 %v2328_v1 }
 0x294   : > { %v1982_v24 = vpop.permute.xlu1 %1981  ;;  %2207 = vmatmul.mubr.msk.f32.vlgmr.msra.gmra.mxu1 %vm1220_vm12, %v2206_v21  ;;  %1729 = vmatprep.subr.mxu0 %v1693_v25 }
 0x295   : > { %2056 = vmatprep.mubr.f32.mxu1 %v2328_v1  ;;  %1730 = vmatpush1.msra.mxu0 %v1692_v23 }
 0x296   : > { %2205 = vmatmul.mubr.msk.f32.vlgmr.msra.gmra.mxu0 %vm1220_vm12, %v2204_v14  ;;  %1920 = vmatprep.subr.mxu0 %v1884_v26  ;;  %v1878_v16 = vpop.permute.xlu0 %1877 }
 0x297   : > { %v1883_v27 = vsel %vm1000_vm11, %v1878_v16, %v1880_v8  ;;  %1954 = vmatprep.mubr.f32.mxu0 %v2328_v1 }
 0x298   : > { %1921 = vmatpush1.msra.mxu0 %v1883_v27  ;;  %v1980_v29 = vpop.permute.xlu1 %1979 }
 0x299   : > { %v1985_v32 = vsel %vm309_vm3, %v1980_v29, %v1982_v24 }
 0x29a   : > { %2209 = vmatmul.mubr.msk.f32.vlgmr.msra.gmra.mxu0 %vm1220_vm12, %v2208_v28  ;;  %v1984_v30 = vpop.permute.xlu0 %1983 }
 0x29b   : > { %v1986_v13 = vsel %vm309_vm3, %v1982_v24, %v1984_v30 }
 0x29c   : > { %2022 = vmatprep.subr.mxu1 %v1986_v13 }
 0x29d   : > { %2023 = vmatpush1.msra.mxu1 %v1985_v32 }
 0x29e   : > { %2211 = vmatmul.mubr.msk.f32.vlgmr.msra.gmra.mxu1 %vm1220_vm12, %v2210_v31 }
 0x2a7   : > { %v1193_v33 = vpop.permute.xlu0 %1192 }
 0x342   : > { %v1381_v34 = vpop.f32.mrf.mxu0 }
 0x344   : > { %v1383_v37 = vpop.f32.mrf.mxu0 }
 0x348   : > { %v1290_v1 = vpop.f32.mrf.mxu1 }
 0x349   : > { %v1295_v35 = vadd.f32 %v1290_v1, %v1193_v33 }
 0x34a   : > { %v1292_v38 = vpop.f32.mrf.mxu1 }
 0x34b   : > { %v1296_v36 = vadd.f32 %v1292_v38, %v1193_v33  ;;  %v1386_v41 = vadd.f32 %v1381_v34, %v1295_v35 }
 0x34c   : > { %v1483_v40 = vpop.f32.mrf.mxu1 }
 0x34d   : > { %v1387_v45 = vadd.f32 %v1383_v37, %v1296_v36  ;;  %v1488_v39 = vadd.f32 %v1483_v40, %v1386_v41 }
 0x34e   : > { %v1485_v42 = vpop.f32.mrf.mxu1 }
 0x34f   : > { %v1489_v48 = vadd.f32 %v1485_v42, %v1387_v45 }
 0x350   : > { %v1663_v47 = vpop.f32.mrf.mxu1 }
 0x352   : > { %v1665_v46 = vpop.f32.mrf.mxu1  ;;  %v1585_v44 = vpop.f32.mrf.mxu0 }
 0x353   : > { %v1590_v49 = vadd.f32 %v1585_v44, %v1488_v39 }
 0x354   : > { %v1587_v50 = vpop.f32.mrf.mxu0  ;;  %v1867_v51 = vpop.f32.mrf.mxu1 }
 0x355   : > { %v1591_v52 = vadd.f32 %v1587_v50, %v1489_v48  ;;  %v1668_v53 = vadd.f32 %v1663_v47, %v1590_v49 }
 0x356   : > { %v1765_v54 = vpop.f32.mrf.mxu0  ;;  %v1869_v58 = vpop.f32.mrf.mxu1 }
 0x357   : > { %v1669_v55 = vadd.f32 %v1665_v46, %v1591_v52  ;;  %v1770_v56 = vadd.f32 %v1765_v54, %v1668_v53 }
 0x358   : > { %v1767_v57 = vpop.f32.mrf.mxu0 }
 0x359   : > { %v1771_v59 = vadd.f32 %v1767_v57, %v1669_v55  ;;  %v1872_v43 = vadd.f32 %v1867_v51, %v1770_v56 }
 0x35a   : > { %v1956_v60 = vpop.f32.mrf.mxu0 }
 0x35b   : > { %v1873_v61 = vadd.f32 %v1869_v58, %v1771_v59  ;;  %v1961_v63 = vadd.f32 %v1956_v60, %v1872_v43 }
 0x35c   : > { %v1958_v62 = vpop.f32.mrf.mxu0 }
 0x35d   : > { %v1962_v2 = vadd.f32 %v1958_v62, %v1873_v61 }
 0x35e   : > { %v2058_v0 = vpop.f32.mrf.mxu1 }
 0x35f   : > { %v2063_v3 = vadd.f32 %v2058_v0, %v1961_v63 }
 0x360   : > { %v2060_v4 = vpop.f32.mrf.mxu1 }
 0x361   : > { %v2065_v5 = vmax.f32 %v2063_v3, 0.0  ;;  %v2064_v6 = vadd.f32 %v2060_v4, %v1962_v2 }
 0x363   : > { %2067 = vst [vmem:[%s277_s8] sm:$0xff] %v2065_v5  ;;  %v2066_v7 = vmax.f32 %v2064_v6, 0.0 }
 0x365   : > { %2068 = vst [vmem:[%s277_s8 + $0x8] sm:$0xff] %v2066_v7 }
 0x366 PF: > { %s18_s21 = sadd.s32 1, %s2324_s21  }
 0x367   : > { %p15_p5 = scmp.ge.s32.totalorder %s18_s21, 4  }
 0x369   :  { %17 = sbr.rel (!%p15_p5) target bundleno = 2 (0x2), region = 100 }
 0x36e   :  { %2090 = vsyncpa [#allocation5], 1 }
 0x36f   :  { %2092 = vsyncpa [#allocation5 + $0x1], 1 }
 0x370   :  { %2093 = vsyncpa [#allocation7], 1 }

</bundles_post_ra>
